<compile_context>
chip_gen: v7x
topology: tpu7x:2x2x1
jax: 0.10.0
libtpu: 0.0.40
codegen_flags: <defaults>
</compile_context>

<pallas_src>
import jax
import jax.numpy as jnp
from jax.experimental import pallas as pl
from jax.experimental.pallas import tpu as pltpu


def _round_up(x, m):
    return (x + m - 1) // m * m


def _linear_model_kernel(x_ref, w1_ref, b1_ref, w2_ref, b2_ref,
                         out_ref, emb_ref):
    # Layer 1: embeddings = x @ W1 + b1   (MXU, f32 accumulate)
    emb_f32 = jnp.dot(x_ref[...], w1_ref[...],
                      preferred_element_type=jnp.float32)
    emb_f32 = emb_f32 + b1_ref[...].astype(jnp.float32)
    emb = emb_f32.astype(emb_ref.dtype)
    emb_ref[...] = emb

    # Layer 2: output = embeddings @ W2 + b2
    # Feed the stored (model-dtype) embedding, exactly like the torch module;
    # for f32 inputs this is identical to chaining the f32 accumulator, and
    # for bf16 it keeps both matmuls on the native bf16 MXU path.
    out_f32 = jnp.dot(emb, w2_ref[...], preferred_element_type=jnp.float32)
    out_f32 = out_f32 + b2_ref[...].astype(jnp.float32)
    out_ref[...] = out_f32.astype(out_ref.dtype)


def linear_model_forward(x, w1, b1, w2, b2, *, batch_tile=1024):
    """x: (B, I); w1: (I, E); b1: (E,) or (1, E); w2: (E, O); b2: (O,) or (1, O).

    Returns (output, embeddings), matching LinearModel.forward.
    (Weights are stored input-major, i.e. already transposed relative to
    torch's nn.Linear .weight, so forward math is x @ w + b.)
    """
    B, I = x.shape
    E = w1.shape[1]
    O = w2.shape[1]
    dtype = x.dtype
    itemsize = jnp.dtype(dtype).itemsize

    # --- lane-dense feature padding (outputs become full 128-lane stores) ---
    E_pad = _round_up(E, 128)
    O_pad = _round_up(O, 128)

    # Resident weight/bias footprint (single-buffered: constant index map).
    weight_bytes = (I * E_pad + E_pad * O_pad + E_pad + O_pad) * itemsize

    # --- batch tiling: biggest tile that fits a conservative VMEM budget ---
    # Budget sized for v7x (64 MiB physical VMEM); batch tiles are
    # double-buffered, weights are resident once.
    vmem_budget = 24 * 1024 * 1024
    row_bytes = (I + E_pad + O_pad) * itemsize          # x + emb + out per row
    TB = _round_up(min(batch_tile, _round_up(B, 8)), 8)
    while TB > 8 and weight_bytes + 2 * TB * row_bytes > vmem_budget:
        TB //= 2
    TB = max(TB, 8)
    B_pad = _round_up(B, TB)

    # Zero padding keeps the math exact (padded weight rows/cols contribute 0,
    # padded bias entries are 0); padded batch rows are sliced away below.
    x_p = jnp.pad(x, ((0, B_pad - B), (0, 0)))
    w1_p = jnp.pad(w1, ((0, 0), (0, E_pad - E)))
    b1_p = jnp.pad(jnp.reshape(b1, (1, E)), ((0, 0), (0, E_pad - E)))
    w2_p = jnp.pad(w2, ((0, E_pad - E), (0, O_pad - O)))
    b2_p = jnp.pad(jnp.reshape(b2, (1, O)), ((0, 0), (0, O_pad - O)))

    grid = (B_pad // TB,)

    needed = weight_bytes + 2 * TB * row_bytes
    vmem_limit = int(min(max(2 * needed, 16 * 1024 * 1024), 32 * 1024 * 1024))

    cost = pl.CostEstimate(
        flops=2 * B_pad * (I * E_pad + E_pad * O_pad),
        transcendentals=0,
        bytes_accessed=(x_p.size + w1_p.size + b1_p.size + w2_p.size
                        + b2_p.size + B_pad * (E_pad + O_pad)) * itemsize,
    )

    out_p, emb_p = pl.pallas_call(
        _linear_model_kernel,
        grid=grid,
        out_shape=(
            jax.ShapeDtypeStruct((B_pad, O_pad), dtype),   # output (padded)
            jax.ShapeDtypeStruct((B_pad, E_pad), dtype),   # embeddings (padded)
        ),
        in_specs=[
            pl.BlockSpec((TB, I), lambda i: (i, 0)),        # x batch tile
            pl.BlockSpec((I, E_pad), lambda i: (0, 0)),     # W1 (resident)
            pl.BlockSpec((1, E_pad), lambda i: (0, 0)),     # b1 (resident)
            pl.BlockSpec((E_pad, O_pad), lambda i: (0, 0)), # W2 (resident)
            pl.BlockSpec((1, O_pad), lambda i: (0, 0)),     # b2 (resident)
        ],
        out_specs=(
            pl.BlockSpec((TB, O_pad), lambda i: (i, 0)),
            pl.BlockSpec((TB, E_pad), lambda i: (i, 0)),
        ),
        compiler_params=pltpu.CompilerParams(
            dimension_semantics=("parallel",),
            vmem_limit_bytes=vmem_limit,
        ),
        cost_estimate=cost,
    )(x_p, w1_p, b1_p, w2_p, b2_p)

    return out_p[:B, :O], emb_p[:B, :E]


if __name__ == "__main__":
    # Small shapes consistent with LinearModel(input_size, embedding_size, output_size)
    batch = 8
    input_size = 32
    embedding_size = 64
    output_size = 16

    key = jax.random.PRNGKey(0)
    kx, kw1, kb1, kw2, kb2 = jax.random.split(key, 5)

    x = jax.random.normal(kx, (batch, input_size), dtype=jnp.float32)

    # Deterministic parameter init (uniform, like torch's default Linear init scale)
    lim1 = 1.0 / jnp.sqrt(input_size)
    w1 = jax.random.uniform(kw1, (input_size, embedding_size),
                            minval=-lim1, maxval=lim1, dtype=jnp.float32)
    b1 = jax.random.uniform(kb1, (1, embedding_size),
                            minval=-lim1, maxval=lim1, dtype=jnp.float32)

    lim2 = 1.0 / jnp.sqrt(embedding_size)
    w2 = jax.random.uniform(kw2, (embedding_size, output_size),
                            minval=-lim2, maxval=lim2, dtype=jnp.float32)
    b2 = jax.random.uniform(kb2, (1, output_size),
                            minval=-lim2, maxval=lim2, dtype=jnp.float32)

    out, emb = jax.jit(linear_model_forward)(x, w1, b1, w2, b2)
    jax.block_until_ready((out, emb))

    # Reference check against plain JAX
    emb_ref = x @ w1 + b1
    out_ref = emb_ref @ w2 + b2
    assert out.shape == (batch, output_size)
    assert emb.shape == (batch, embedding_size)
    assert jnp.allclose(emb, emb_ref, atol=1e-5, rtol=1e-5)
    assert jnp.allclose(out, out_ref, atol=1e-5, rtol=1e-5)

    print("KERNEL_OK")
</pallas_src>

<mosaic_0001>
module attributes {stable_mosaic.version = 11 : i64} {
  func.func @_linear_model_kernel(%arg0: i32, %arg1: memref<8x32xf32, #tpu.memory_space<vmem>>, %arg2: memref<32x128xf32, #tpu.memory_space<vmem>>, %arg3: memref<1x128xf32, #tpu.memory_space<vmem>>, %arg4: memref<128x128xf32, #tpu.memory_space<vmem>>, %arg5: memref<1x128xf32, #tpu.memory_space<vmem>>, %arg6: memref<8x128xf32, #tpu.memory_space<vmem>>, %arg7: memref<8x128xf32, #tpu.memory_space<vmem>>) attributes {dimension_semantics = [#tpu.dimension_semantics<parallel>], iteration_bounds = array<i64: 1>, scalar_prefetch = 0 : i64, scratch_operands = 0 : i64, tpu.core_type = #tpu.core_type<tc>, window_params = [{transform_indices = @transform_0, window_bounds = array<i64: 8, 32>}, {pipeline_mode = #tpu.pipeline_mode<synchronous>, transform_indices = @transform_1, window_bounds = array<i64: 32, 128>}, {pipeline_mode = #tpu.pipeline_mode<synchronous>, transform_indices = @transform_2, window_bounds = array<i64: 1, 128>}, {pipeline_mode = #tpu.pipeline_mode<synchronous>, transform_indices = @transform_3, window_bounds = array<i64: 128, 128>}, {pipeline_mode = #tpu.pipeline_mode<synchronous>, transform_indices = @transform_4, window_bounds = array<i64: 1, 128>}, {transform_indices = @transform_5, window_bounds = array<i64: 8, 128>}, {transform_indices = @transform_6, window_bounds = array<i64: 8, 128>}]} {
    %c0 = arith.constant 0 : index
    %c0_0 = arith.constant 0 : index
    %0 = vector.load %arg1[%c0, %c0_0] : memref<8x32xf32, #tpu.memory_space<vmem>>, vector<8x32xf32>
    %c0_1 = arith.constant 0 : index
    %c0_2 = arith.constant 0 : index
    %1 = vector.load %arg2[%c0_1, %c0_2] : memref<32x128xf32, #tpu.memory_space<vmem>>, vector<32x128xf32>
    %cst = arith.constant dense<0.000000e+00> : vector<8x128xf32>
    %2 = tpu.matmul %0, %1, %cst {dimension_numbers = #tpu.dot_dimension_numbers<[1], [0], [0], [1], [0, 0, 1, 1], [], []>} : vector<8x32xf32>, vector<32x128xf32>, vector<8x128xf32> -> vector<8x128xf32>
    %c0_3 = arith.constant 0 : index
    %c0_4 = arith.constant 0 : index
    %3 = vector.load %arg3[%c0_3, %c0_4] : memref<1x128xf32, #tpu.memory_space<vmem>>, vector<1x128xf32>
    %4 = vector.broadcast %3 : vector<1x128xf32> to vector<8x128xf32>
    %5 = arith.addf %2, %4 : vector<8x128xf32>
    %c0_5 = arith.constant 0 : index
    %c0_6 = arith.constant 0 : index
    %6 = vector.load %arg7[%c0_5, %c0_6] : memref<8x128xf32, #tpu.memory_space<vmem>>, vector<8x128xf32>
    tpu.vector_store %arg7[%c0_5, %c0_6], %5 {strides = array<i32>} : memref<8x128xf32, #tpu.memory_space<vmem>>, vector<8x128xf32>,
    %c0_7 = arith.constant 0 : index
    %c0_8 = arith.constant 0 : index
    %7 = vector.load %arg4[%c0_7, %c0_8] : memref<128x128xf32, #tpu.memory_space<vmem>>, vector<128x128xf32>
    %cst_9 = arith.constant dense<0.000000e+00> : vector<8x128xf32>
    %8 = tpu.matmul %5, %7, %cst_9 {dimension_numbers = #tpu.dot_dimension_numbers<[1], [0], [0], [1], [0, 0, 1, 1], [], []>} : vector<8x128xf32>, vector<128x128xf32>, vector<8x128xf32> -> vector<8x128xf32>
    %c0_10 = arith.constant 0 : index
    %c0_11 = arith.constant 0 : index
    %9 = vector.load %arg5[%c0_10, %c0_11] : memref<1x128xf32, #tpu.memory_space<vmem>>, vector<1x128xf32>
    %10 = vector.broadcast %9 : vector<1x128xf32> to vector<8x128xf32>
    %11 = arith.addf %8, %10 : vector<8x128xf32>
    %c0_12 = arith.constant 0 : index
    %c0_13 = arith.constant 0 : index
    %12 = vector.load %arg6[%c0_12, %c0_13] : memref<8x128xf32, #tpu.memory_space<vmem>>, vector<8x128xf32>
    tpu.vector_store %arg6[%c0_12, %c0_13], %11 {strides = array<i32>} : memref<8x128xf32, #tpu.memory_space<vmem>>, vector<8x128xf32>,
    return
  }
  func.func @transform_0(%arg0: i32) -> (i32, i32) {
    %c0_i32 = arith.constant 0 : i32
    %c0_i32_0 = arith.constant 0 : i32
    return %arg0, %c0_i32 : i32, i32
  }
  func.func @transform_1(%arg0: i32) -> (i32, i32) {
    %c0_i32 = arith.constant 0 : i32
    %c0_i32_0 = arith.constant 0 : i32
    %c0_i32_1 = arith.constant 0 : i32
    return %c0_i32, %c0_i32_0 : i32, i32
  }
  func.func @transform_2(%arg0: i32) -> (i32, i32) {
    %c0_i32 = arith.constant 0 : i32
    %c0_i32_0 = arith.constant 0 : i32
    %c0_i32_1 = arith.constant 0 : i32
    return %c0_i32, %c0_i32_0 : i32, i32
  }
  func.func @transform_3(%arg0: i32) -> (i32, i32) {
    %c0_i32 = arith.constant 0 : i32
    %c0_i32_0 = arith.constant 0 : i32
    %c0_i32_1 = arith.constant 0 : i32
    return %c0_i32, %c0_i32_0 : i32, i32
  }
  func.func @transform_4(%arg0: i32) -> (i32, i32) {
    %c0_i32 = arith.constant 0 : i32
    %c0_i32_0 = arith.constant 0 : i32
    %c0_i32_1 = arith.constant 0 : i32
    return %c0_i32, %c0_i32_0 : i32, i32
  }
  func.func @transform_5(%arg0: i32) -> (i32, i32) {
    %c0_i32 = arith.constant 0 : i32
    %c0_i32_0 = arith.constant 0 : i32
    return %arg0, %c0_i32 : i32, i32
  }
  func.func @transform_6(%arg0: i32) -> (i32, i32) {
    %c0_i32 = arith.constant 0 : i32
    %c0_i32_0 = arith.constant 0 : i32
    return %arg0, %c0_i32 : i32, i32
  }
}

</mosaic_0001>

<bundles_post_ra>
// kernel: linear_model_forward.1
= control target key start
LH: loop header
LB: loop body
LE: loop exit
PB: predicated region body
PF: predicated region fallthrough
CT: control target
= control target key end

     0   :  { %12 = vsyncpa [#allocation3], 0  ;;  %v387_v3 = vmov 0.0|0.0   ;;  %vm388_vm0 = vmmov 0   ;;  %v389_v6 = vmov 0.0   ;;  %s520_s0 = inlined_call_operand.vmem [shape: f32[8,32], index: 0, kind: input, shape index: {}]   ;;  %s521_s1 = inlined_call_operand.vmem [shape: f32[32,128], index: 1, kind: input, shape index: {}]   ;;  %s522_s2 = inlined_call_operand.vmem [shape: f32[1,128], index: 2, kind: input, shape index: {}]   ;;  %s523_s3 = inlined_call_operand.vmem [shape: f32[128,128], index: 3, kind: input, shape index: {}]   ;;  %s524_s4 = inlined_call_operand.vmem [shape: f32[1,128], index: 4, kind: input, shape index: {}]   ;;  %s525_s5 = inlined_call_operand.hbm [shape: f32[8,128], index: 5, kind: output, shape index: {0}]   ;;  %s526_s6 = inlined_call_operand.hbm [shape: f32[8,128], index: 6, kind: output, shape index: {1}]  }
   0x1   :  { %v25_v0 = vld [vmem:[%s521_s1] sm:$0xff]  ;;  %v26_v1 = vld [vmem:[%s521_s1 + $0x8] sm:$0xff]  ;;  %v27_v2 = vld [vmem:[%s521_s1 + $0x10] sm:$0xff]  ;;  %304 = vmatprep.subr.bf16.mxu0 %v387_v3  ;;  %266 = vmatprep.mubr.msk.f32.mxu0 %vm388_vm0, %v389_v6 }
   0x2   :  { %v305_v4 = vpack.c.bf16 %v26_v1, %v25_v0  ;;  %v28_v5 = vld [vmem:[%s521_s1 + $0x18] sm:$0xff]  ;;  %v111_v7 = vld [vmem:[%s523_s3] sm:$0xff]  ;;  %310 = vmatprep.subr.bf16.mxu1 %v387_v3  ;;  %v112_v8 = vld [vmem:[%s523_s3 + $0x8] sm:$0xff]  ;;  %301 = vmatprep.mubr.msk.f32.mxu1 %vm388_vm0, %v389_v6 }
   0x3   :  { %v113_v9 = vld [vmem:[%s523_s3 + $0x10] sm:$0xff]  ;;  %v114_v10 = vld [vmem:[%s523_s3 + $0x18] sm:$0xff]  ;;  %v308_v11 = vpack.c.bf16 %v28_v5, %v27_v2  ;;  %v311_v12 = vpack.c.bf16 %v112_v8, %v111_v7  ;;  %v115_v14 = vld [vmem:[%s523_s3 + $0x20] sm:$0xff] }
   0x4   :  { %306 = vmatpush3.bf16.msra.mxu0 %v305_v4  ;;  %v314_v13 = vpack.c.bf16 %v114_v10, %v113_v9  ;;  %v116_v15 = vld [vmem:[%s523_s3 + $0x28] sm:$0xff] }
   0x5   :  { %307 = vmatprep.subr.bf16.mxu0 %v387_v3  ;;  %312 = vmatpush3.bf16.msra.mxu1 %v311_v12 }
   0x6   :  { %313 = vmatprep.subr.bf16.mxu1 %v387_v3 }
   0x7   :  { %13 = vsyncpa [#allocation5], 0  ;;  %v24_v16 = vld [vmem:[%s520_s0] sm:$0xff]  ;;  %vm36_vm1 = vcmask 261120   ;;  %v317_v17 = vpack.c.bf16 %v116_v15, %v115_v14  ;;  %v117_v18 = vld [vmem:[%s523_s3 + $0x30] sm:$0xff]  ;;  %s390_s14 = smov [#allocation4]  }
   0x8   :  { %309 = vmatpush3.bf16.msra.mxu0 %v308_v11  ;;  %v118_v19 = vld [vmem:[%s523_s3 + $0x38] sm:$0xff]  ;;  %v119_v21 = vld [vmem:[%s523_s3 + $0x40] sm:$0xff]  ;;  %v120_v22 = vld [vmem:[%s523_s3 + $0x48] sm:$0xff]  ;;  %s221_s15 = sshll.u32 %s390_s14, 4  ;;  %s222_s15 = int_to_ptr.vmem [resolvable:$true] %s221_s15 }
   0x9   :  { %315 = vmatpush3.bf16.msra.mxu1 %v314_v13  ;;  %v320_v20 = vpack.c.bf16 %v118_v19, %v117_v18  ;;  %v323_v23 = vpack.c.bf16 %v120_v22, %v119_v21  ;;  %v121_v24 = vld [vmem:[%s523_s3 + $0x50] sm:$0xff]  ;;  %v122_v25 = vld [vmem:[%s523_s3 + $0x58] sm:$0xff]  ;;  %v123_v27 = vld [vmem:[%s523_s3 + $0x60] sm:$0xff]  ;;  %s339_s16 = scalar_lea.vmem %s222_s15, 128  ;;  %p344_p1 = scmp.lt.s32.totalorder %s222_s15, %s222_s15 }
   0xa   :  { %316 = vmatprep.subr.bf16.mxu1 %v387_v3  ;;  %v326_v26 = vpack.c.bf16 %v122_v25, %v121_v24  ;;  %v124_v28 = vld [vmem:[%s523_s3 + $0x68] sm:$0xff]  ;;  %v125_v30 = vld [vmem:[%s523_s3 + $0x70] sm:$0xff]  ;;  %v126_v31 = vld [vmem:[%s523_s3 + $0x78] sm:$0xff]  ;;  %p340_p0 = scmp.ne.s32.totalorder %s222_s15, %s339_s16  ;;  %p345_p2 = scmp.lt.s32.totalorder %s339_s16, %s339_s16 }
   0xb   :  { %267 = vmatmul.mubr.msk.f32.vlgmr.msra.gmra.mrb[0].mxu0 %vm36_vm1, %v24_v16  ;;  %v329_v29 = vpack.c.bf16 %v124_v28, %v123_v27  ;;  %v332_v32 = vpack.c.bf16 %v126_v31, %v125_v30  ;;  %v233_v33 = vld [vmem:[%s522_s2] ss:$0 sm:$0xff] }
   0xc   :  { %p346_p3 = por %p345_p2, %p344_p1 }
   0xd   :  { %318 = vmatpush3.bf16.msra.mxu1 %v317_v17 }
   0xe   :  { %319 = vmatprep.subr.bf16.mxu1 %v387_v3  ;;  %p347_p4 = pnand %p346_p3, %p340_p0 }
  0x11   :  { %321 = vmatpush3.bf16.msra.mxu1 %v320_v20 }
  0x12   :  { %322 = vmatprep.subr.bf16.mxu1 %v387_v3 }
  0x15   :  { %324 = vmatpush3.bf16.msra.mxu1 %v323_v23 }
  0x16   :  { %325 = vmatprep.subr.bf16.mxu1 %v387_v3 }
  0x19   :  { %327 = vmatpush3.bf16.msra.mxu1 %v326_v26 }
  0x1a   :  { %328 = vmatprep.subr.bf16.mxu1 %v387_v3 }
  0x1d   :  { %330 = vmatpush3.bf16.msra.mxu1 %v329_v29 }
  0x1e   :  { %331 = vmatprep.subr.bf16.mxu1 %v387_v3 }
  0x21   :  { %333 = vmatpush3.bf16.msra.mxu1 %v332_v32 }
  0xde   :  { %v106_v34 = vpop.f32.mrb[0].mxu0 }
  0xdf   :  { %v107_v35 = vadd.f32 %v233_v33, %v106_v34  ;;  %v268_v36 = vpop.f32.mrb[1].mxu0 }
  0xe1   :  { %110 = vst [vmem:[#allocation4] sm:$0xff] %v107_v35  ;;  %302 = vmatmul.mubr.f32.vlgmr.msra.gmra.mrb[0].mxu1 %v107_v35 }
  0xe2   :  { %350 = shalt.err (!%p347_p4)
}
  0xe3   :  { %s351_s18 = scalar_lea.hbm %s526_s6, 128 }
  0xe4   :  { %p352_p5 = scmp.ne.s32.totalorder %s526_s6, %s351_s18  ;;  %p355_p6 = scmp.lt.u32.totalorder %s351_s18, %s526_s6 }
  0xe6   :  { %p357_p7 = pnand %p355_p6, %p352_p5 }
  0xe8   :  { %360 = shalt.err (!%p357_p7)
}
  0xe9   :  { %224 = dma.vmem_to_hbm [thread:$0]  %s222_s15, 128, %s526_s6, [#allocation5]   ;;  %v235_v37 = vld [vmem:[%s524_s4] ss:$0 sm:$0xff] }
  0xea   :  { %s391_s25 = smov [#allocation2]  }
  0xeb   :  { %s211_s26 = sshll.u32 %s391_s25, 4  ;;  %s212_s26 = int_to_ptr.vmem [resolvable:$true] %s211_s26 }
  0xec   :  { %s361_s27 = scalar_lea.vmem %s212_s26, 128  ;;  %p366_p9 = scmp.lt.s32.totalorder %s212_s26, %s212_s26 }
  0xed   :  { %p362_p8 = scmp.ne.s32.totalorder %s212_s26, %s361_s27  ;;  %p367_p10 = scmp.lt.s32.totalorder %s361_s27, %s361_s27 }
  0xef   :  { %p368_p11 = por %p367_p10, %p366_p9 }
  0xf1   :  { %p369_p12 = pnand %p368_p11, %p362_p8 }
 0x1b4   :  { %v200_v38 = vpop.f32.mrb[0].mxu1 }
 0x1b5   :  { %v201_v39 = vadd.f32 %v235_v37, %v200_v38  ;;  %v303_v40 = vpop.f32.mrb[1].mxu1 }
 0x1b7   :  { %204 = vst [vmem:[#allocation2] sm:$0xff] %v201_v39 }
 0x1b8   :  { %372 = shalt.err (!%p369_p12)
}
 0x1b9   :  { %s373_s29 = scalar_lea.hbm %s525_s5, 128 }
 0x1ba   :  { %p374_p13 = scmp.ne.s32.totalorder %s525_s5, %s373_s29  ;;  %p377_p0 = scmp.lt.u32.totalorder %s373_s29, %s525_s5 }
 0x1bc   :  { %p379_p1 = pnand %p377_p0, %p374_p13 }
 0x1be   :  { %382 = shalt.err (!%p379_p1)
}
 0x1bf   :  { %214 = dma.vmem_to_hbm [thread:$0]  %s212_s26, 128, %s525_s5, [#allocation3]  }
 0x1c0   :  { %383 = dma.done.wait [#allocation3], 128  }
 0x1c1   :  { %384 = vsyncadd [#allocation3], 4294967168 }
 0x1c2   :  { %385 = dma.done.wait [#allocation5], 128  }
 0x1c3   :  { %386 = vsyncadd [#allocation5], 4294967168 }
 0x1c4   :  { %231 = vsyncpa [#allocation3], 1 }
 0x1c5   :  { %232 = vsyncpa [#allocation5], 1 }

</bundles_post_ra>
